<compile_context>
chip_gen: v7x
topology: tpu7x:2x2x1
jax: 0.10.0
libtpu: 0.0.40
codegen_flags: <defaults>
</compile_context>

<pallas_src>
import jax
import jax.numpy as jnp
from jax.experimental import pallas as pl
from jax.experimental.pallas import tpu as pltpu


# ----------------------------------------------------------------------------
# Pallas kernel (shared by the 1x1 conv and the embed-bank bmm)
# ----------------------------------------------------------------------------
def _proj_bias_kernel(w_ref, x_ref, b_ref, o_ref):
    """o (M, TN) = w (M, K) @ x (K, TN) + b (M, 1)   (lane-dense along TN)."""
    M, K = w_ref.shape
    TN = x_ref.shape[1]
    w = w_ref[...]
    x = x_ref[...]
    if K <= 16:
        # Tiny contraction (e.g. K = 2*num_queries = 8): an MXU matmul would fill only
        # K/128 of the systolic array, so do K broadcast-FMA steps on the VPU instead.
        acc = jnp.broadcast_to(b_ref[...], (M, TN))
        for k in range(K):                      # static unroll; K is a trace-time const
            acc = acc + w[:, k:k + 1] * x[k:k + 1, :]
        o_ref[...] = acc
    else:
        # Real-model channel counts (C_in >= 256): MXU path, f32 accumulation.
        # TODO(synk): add a K grid axis + scratch accumulator if K*TN tiles ever exceed
        # the VMEM budget (not the case for typical bottleneck shapes).
        o_ref[...] = jnp.dot(w, x, preferred_element_type=jnp.float32) + b_ref[...]


def pallas_channel_proj(w, x_bkn, bias, *, tn=None):
    """Batched lane-dense projection: out[b] = w @ x[b] + bias.

    w:     (M, K)    float32   (PyTorch Conv2d 1x1 weight layout: (out_ch, in_ch))
    x_bkn: (B, K, N) float32   channels-first; N = H*W (or seq len), multiple of 128
    bias:  (M,) or (M, 1)
    returns (B, M, N) float32
    """
    B, K, N = x_bkn.shape
    M = w.shape[0]
    assert w.shape == (M, K)
    assert N % 128 == 0, "lane axis (H*W / seq) must be a multiple of 128"
    bias = bias.reshape(M, 1).astype(jnp.float32)
    if tn is None:
        tn = min(N, 512)
        while N % tn:
            tn -= 128
    grid = (B, N // tn)
    return pl.pallas_call(
        _proj_bias_kernel,
        out_shape=jax.ShapeDtypeStruct((B, M, N), jnp.float32),
        grid=grid,
        in_specs=[
            pl.BlockSpec((M, K), lambda b, n: (0, 0)),            # weights stay resident
            pl.BlockSpec((None, K, tn), lambda b, n: (b, 0, n)),  # per-batch / per-N tile
            pl.BlockSpec((M, 1), lambda b, n: (0, 0)),            # bias stays resident
        ],
        out_specs=pl.BlockSpec((None, M, tn), lambda b, n: (b, 0, n)),
        compiler_params=pltpu.CompilerParams(
            dimension_semantics=("parallel", "parallel")),
    )(w.astype(jnp.float32), x_bkn.astype(jnp.float32), bias)


# ----------------------------------------------------------------------------
# Box conversions: ~64 flops total -> plain jnp (no Pallas launch)
# ----------------------------------------------------------------------------
def box_xyxy_to_xywh(b):
    x0, y0, x1, y1 = b[..., 0], b[..., 1], b[..., 2], b[..., 3]
    return jnp.stack([x0, y0, x1 - x0, y1 - y0], axis=-1)


def box_xyxy_to_cxcywh(b):
    x0, y0, x1, y1 = b[..., 0], b[..., 1], b[..., 2], b[..., 3]
    return jnp.stack([(x0 + x1) * 0.5, (y0 + y1) * 0.5, x1 - x0, y1 - y0], axis=-1)


# ----------------------------------------------------------------------------
# BASELINE forward-pass pieces
# ----------------------------------------------------------------------------
def init_params(key, num_channels, hidden_dim, num_queries):
    k1, k2, k3, k4 = jax.random.split(key, 4)
    return {
        # nn.Conv2d(num_channels, hidden_dim, 1x1): PyTorch layout (out, in) == (hidden, C_in)
        "bottleneck_w": 0.1 * jax.random.normal(k1, (hidden_dim, num_channels), jnp.float32),
        "bottleneck_b": 0.1 * jax.random.normal(k2, (hidden_dim,), jnp.float32),
        "foreground_embed": 0.1 * jax.random.normal(k3, (num_queries, hidden_dim), jnp.float32),
        "background_embed": 0.1 * jax.random.normal(k4, (num_queries, hidden_dim), jnp.float32),
    }


def adjust(params, src_feat, mask, pos_embed, inr_embed):
    """BASELINE.adjust: bottleneck 1x1 conv + flatten(2).permute(2,0,1).

    src_feat: (B, C_in, H, W) NCHW -- consumed natively (no pre-kernel transpose);
    pos/inr:  (B, hidden, H, W);  mask: (B, H, W).
    """
    B, C_in, H, W = src_feat.shape
    hidden = params["bottleneck_w"].shape[0]
    x = src_feat.reshape(B, C_in, H * W)                           # free reshape, NCHW kept
    feat_bcn = pallas_channel_proj(params["bottleneck_w"], x, params["bottleneck_b"])
    feat_vec = jnp.transpose(feat_bcn, (2, 0, 1))                  # == flatten(2).permute(2,0,1)
    pos_vec = jnp.transpose(pos_embed.reshape(B, hidden, H * W), (2, 0, 1))
    inr_vec = jnp.transpose(inr_embed.reshape(B, hidden, H * W), (2, 0, 1))
    mask_vec = mask.reshape(B, H * W)
    return {"feat": feat_vec, "mask": mask_vec, "pos": pos_vec, "inr": inr_vec}


def forward_backbone(params, src_feat, mask, pos_embed, inr_embed):
    # TODO(synk): the backbone CNN itself (backbone.py) is an external module; only the
    # BASELINE-owned bottleneck/adjust step is implemented here.
    return adjust(params, src_feat, mask, pos_embed, inr_embed)


def forward_transformer(params, search_dic, refer_dic, refer_reg):
    """BASELINE.forward_transformer core (embed_bank + bmm refer_emb).

    TODO(synk): transformer.run_encoder / run_decoder are external modules, so
    search_mem / output_embed are not reproducible from this file and are omitted.
    """
    bs = search_dic["feat"].shape[1]
    B, HW, two_nq = refer_reg.shape
    assert B == bs
    hidden = params["foreground_embed"].shape[1]
    # embed_bank = cat([fg, bg], dim=0) -> (2*Nq, hidden); feed its transpose so the
    # kernel output is lane-dense along HW (same shared kernel as the 1x1 conv).
    embed_bank_t = jnp.concatenate(
        [params["foreground_embed"].T, params["background_embed"].T], axis=1)  # (hidden, 2*Nq)
    reg_t = jnp.transpose(refer_reg, (0, 2, 1))                                # (B, 2*Nq, HW), tiny
    emb_bcn = pallas_channel_proj(embed_bank_t, reg_t, jnp.zeros((hidden,), jnp.float32))
    refer_emb = jnp.transpose(emb_bcn, (2, 0, 1))   # == bmm(refer_reg, bank).transpose(0,1)
    refer_pos = refer_dic["inr"]
    refer_msk = refer_dic["mask"]
    return refer_emb, refer_pos, refer_msk, search_dic["inr"], search_dic["mask"]


def forward_box_head(hs, bbox_coor_xyxy):
    """BASELINE.forward_box_head.  hs: (1, HW, B, C)."""
    opt = jnp.transpose(hs, (2, 0, 3, 1))        # (B, Nq, C, HW) == hs.permute(2,0,3,1)
    bs, Nq, C, HW = opt.shape
    # TODO(synk): box_head (CORNER corner-predictor conv stack) is an external module;
    # bbox_coor_xyxy stands in for its (bs*Nq, 4) xyxy output.
    coord_in_crop = box_xyxy_to_xywh(bbox_coor_xyxy)
    outputs_coord = box_xyxy_to_cxcywh(bbox_coor_xyxy)
    outputs_coord_new = outputs_coord.reshape(bs, Nq, 4)
    out = {"pred_boxes": outputs_coord_new}
    return out, coord_in_crop


# ----------------------------------------------------------------------------
# Demo / correctness check
# ----------------------------------------------------------------------------
if __name__ == "__main__":
    key = jax.random.PRNGKey(0)
    B, C_in, H, W = 2, 8, 16, 16
    hidden_dim = 32
    num_queries = 4
    HW = H * W

    params = init_params(key, C_in, hidden_dim, num_queries)

    ks = jax.random.split(jax.random.PRNGKey(1), 8)
    src_feat = jax.random.normal(ks[0], (B, C_in, H, W), jnp.float32)
    refer_feat = jax.random.normal(ks[3], (B, C_in, H, W), jnp.float32)
    mask = jnp.zeros((B, H, W), jnp.bool_)
    pos_embed = jax.random.normal(ks[1], (B, hidden_dim, H, W), jnp.float32)
    inr_embed = jax.random.normal(ks[2], (B, hidden_dim, H, W), jnp.float32)

    # mode='backbone'
    search_dic = forward_backbone(params, src_feat, mask, pos_embed, inr_embed)
    refer_dic = forward_backbone(params, refer_feat, mask, pos_embed, inr_embed)

    # mode='transformer' (embed-bank bmm part)
    refer_reg = jax.nn.softmax(
        jax.random.normal(ks[4], (B, HW, 2 * num_queries), jnp.float32), axis=-1)
    refer_emb, refer_pos, refer_msk, s_inr, s_msk = forward_transformer(
        params, search_dic, refer_dic, refer_reg)

    # mode='head'
    hs = jax.random.normal(ks[5], (1, HW, B, hidden_dim), jnp.float32)
    bbox_xyxy = jax.random.uniform(ks[6], (B * 1, 4), jnp.float32)
    bbox_xyxy = jnp.concatenate(
        [bbox_xyxy[:, :2] * 0.4, 0.5 + bbox_xyxy[:, 2:] * 0.4], axis=-1)  # well-ordered xyxy
    out, coord_in_crop = forward_box_head(hs, bbox_xyxy)

    jax.block_until_ready(
        (search_dic["feat"], refer_emb, out["pred_boxes"], coord_in_crop))

    # ---- reference checks (plain jnp, highest precision) ----
    hp = jax.lax.Precision.HIGHEST
    feat_ref = (jnp.einsum("bchw,dc->bdhw", src_feat, params["bottleneck_w"], precision=hp)
                + params["bottleneck_b"][None, :, None, None])
    feat_vec_ref = jnp.transpose(feat_ref.reshape(B, hidden_dim, HW), (2, 0, 1))
    assert jnp.allclose(search_dic["feat"], feat_vec_ref, atol=1e-5, rtol=1e-5)

    embed_bank = jnp.concatenate(
        [params["foreground_embed"], params["background_embed"]], axis=0)
    refer_emb_ref = jnp.transpose(
        jnp.einsum("bhk,kd->bhd", refer_reg, embed_bank, precision=hp), (1, 0, 2))
    assert jnp.allclose(refer_emb, refer_emb_ref, atol=1e-5, rtol=1e-5)

    x0, y0, x1, y1 = [bbox_xyxy[:, i] for i in range(4)]
    xywh_ref = jnp.stack([x0, y0, x1 - x0, y1 - y0], axis=-1)
    cxcy_ref = jnp.stack([(x0 + x1) / 2, (y0 + y1) / 2, x1 - x0, y1 - y0], axis=-1)
    assert jnp.allclose(coord_in_crop, xywh_ref, atol=1e-5, rtol=1e-5)
    assert jnp.allclose(out["pred_boxes"].reshape(-1, 4), cxcy_ref, atol=1e-5, rtol=1e-5)

    print("KERNEL_OK")
</pallas_src>

<mosaic_0001>
module attributes {stable_mosaic.version = 11 : i64} {
  func.func @_proj_bias_kernel(%arg0: i32, %arg1: i32, %arg2: memref<32x8xf32, #tpu.memory_space<vmem>>, %arg3: memref<1x8x256xf32, #tpu.memory_space<vmem>>, %arg4: memref<32x1xf32, #tpu.memory_space<vmem>>, %arg5: memref<1x32x256xf32, #tpu.memory_space<vmem>>) attributes {dimension_semantics = [#tpu.dimension_semantics<parallel>, #tpu.dimension_semantics<parallel>], iteration_bounds = array<i64: 2, 1>, scalar_prefetch = 0 : i64, scratch_operands = 0 : i64, tpu.core_type = #tpu.core_type<tc>, window_params = [{pipeline_mode = #tpu.pipeline_mode<synchronous>, transform_indices = @transform_0, window_bounds = array<i64: 32, 8>}, {transform_indices = @transform_1, window_bounds = array<i64: 1, 8, 256>}, {pipeline_mode = #tpu.pipeline_mode<synchronous>, transform_indices = @transform_2, window_bounds = array<i64: 32, 1>}, {transform_indices = @transform_3, window_bounds = array<i64: 1, 32, 256>}]} {
    %c0 = arith.constant 0 : index
    %c0_0 = arith.constant 0 : index
    %0 = vector.load %arg2[%c0, %c0_0] : memref<32x8xf32, #tpu.memory_space<vmem>>, vector<32x8xf32>
    %c0_1 = arith.constant 0 : index
    %c0_2 = arith.constant 0 : index
    %c0_3 = arith.constant 0 : index
    %1 = vector.load %arg3[%c0_1, %c0_2, %c0_3] : memref<1x8x256xf32, #tpu.memory_space<vmem>>, vector<1x8x256xf32>
    %2 = vector.shape_cast %1 : vector<1x8x256xf32> to vector<8x256xf32>
    %c0_4 = arith.constant 0 : index
    %c0_5 = arith.constant 0 : index
    %3 = vector.load %arg4[%c0_4, %c0_5] : memref<32x1xf32, #tpu.memory_space<vmem>>, vector<32x1xf32>
    %4 = vector.shape_cast %3 : vector<32x1xf32> to vector<32x1xf32>
    %5 = vector.broadcast %4 : vector<32x1xf32> to vector<32x256xf32>
    %6 = vector.extract_strided_slice %0 {offsets = [0, 0], sizes = [32, 1], strides = [1, 1]} : vector<32x8xf32> to vector<32x1xf32>
    %7 = vector.extract_strided_slice %2 {offsets = [0, 0], sizes = [1, 256], strides = [1, 1]} : vector<8x256xf32> to vector<1x256xf32>
    %8 = vector.broadcast %6 : vector<32x1xf32> to vector<32x256xf32>
    %9 = vector.broadcast %7 : vector<1x256xf32> to vector<32x256xf32>
    %10 = arith.mulf %8, %9 : vector<32x256xf32>
    %11 = arith.addf %5, %10 : vector<32x256xf32>
    %12 = vector.extract_strided_slice %0 {offsets = [0, 1], sizes = [32, 1], strides = [1, 1]} : vector<32x8xf32> to vector<32x1xf32>
    %13 = vector.extract_strided_slice %2 {offsets = [1, 0], sizes = [1, 256], strides = [1, 1]} : vector<8x256xf32> to vector<1x256xf32>
    %14 = vector.broadcast %12 : vector<32x1xf32> to vector<32x256xf32>
    %15 = vector.broadcast %13 : vector<1x256xf32> to vector<32x256xf32>
    %16 = arith.mulf %14, %15 : vector<32x256xf32>
    %17 = arith.addf %11, %16 : vector<32x256xf32>
    %18 = vector.extract_strided_slice %0 {offsets = [0, 2], sizes = [32, 1], strides = [1, 1]} : vector<32x8xf32> to vector<32x1xf32>
    %19 = vector.extract_strided_slice %2 {offsets = [2, 0], sizes = [1, 256], strides = [1, 1]} : vector<8x256xf32> to vector<1x256xf32>
    %20 = vector.broadcast %18 : vector<32x1xf32> to vector<32x256xf32>
    %21 = vector.broadcast %19 : vector<1x256xf32> to vector<32x256xf32>
    %22 = arith.mulf %20, %21 : vector<32x256xf32>
    %23 = arith.addf %17, %22 : vector<32x256xf32>
    %24 = vector.extract_strided_slice %0 {offsets = [0, 3], sizes = [32, 1], strides = [1, 1]} : vector<32x8xf32> to vector<32x1xf32>
    %25 = vector.extract_strided_slice %2 {offsets = [3, 0], sizes = [1, 256], strides = [1, 1]} : vector<8x256xf32> to vector<1x256xf32>
    %26 = vector.broadcast %24 : vector<32x1xf32> to vector<32x256xf32>
    %27 = vector.broadcast %25 : vector<1x256xf32> to vector<32x256xf32>
    %28 = arith.mulf %26, %27 : vector<32x256xf32>
    %29 = arith.addf %23, %28 : vector<32x256xf32>
    %30 = vector.extract_strided_slice %0 {offsets = [0, 4], sizes = [32, 1], strides = [1, 1]} : vector<32x8xf32> to vector<32x1xf32>
    %31 = vector.extract_strided_slice %2 {offsets = [4, 0], sizes = [1, 256], strides = [1, 1]} : vector<8x256xf32> to vector<1x256xf32>
    %32 = vector.broadcast %30 : vector<32x1xf32> to vector<32x256xf32>
    %33 = vector.broadcast %31 : vector<1x256xf32> to vector<32x256xf32>
    %34 = arith.mulf %32, %33 : vector<32x256xf32>
    %35 = arith.addf %29, %34 : vector<32x256xf32>
    %36 = vector.extract_strided_slice %0 {offsets = [0, 5], sizes = [32, 1], strides = [1, 1]} : vector<32x8xf32> to vector<32x1xf32>
    %37 = vector.extract_strided_slice %2 {offsets = [5, 0], sizes = [1, 256], strides = [1, 1]} : vector<8x256xf32> to vector<1x256xf32>
    %38 = vector.broadcast %36 : vector<32x1xf32> to vector<32x256xf32>
    %39 = vector.broadcast %37 : vector<1x256xf32> to vector<32x256xf32>
    %40 = arith.mulf %38, %39 : vector<32x256xf32>
    %41 = arith.addf %35, %40 : vector<32x256xf32>
    %42 = vector.extract_strided_slice %0 {offsets = [0, 6], sizes = [32, 1], strides = [1, 1]} : vector<32x8xf32> to vector<32x1xf32>
    %43 = vector.extract_strided_slice %2 {offsets = [6, 0], sizes = [1, 256], strides = [1, 1]} : vector<8x256xf32> to vector<1x256xf32>
    %44 = vector.broadcast %42 : vector<32x1xf32> to vector<32x256xf32>
    %45 = vector.broadcast %43 : vector<1x256xf32> to vector<32x256xf32>
    %46 = arith.mulf %44, %45 : vector<32x256xf32>
    %47 = arith.addf %41, %46 : vector<32x256xf32>
    %48 = vector.extract_strided_slice %0 {offsets = [0, 7], sizes = [32, 1], strides = [1, 1]} : vector<32x8xf32> to vector<32x1xf32>
    %49 = vector.extract_strided_slice %2 {offsets = [7, 0], sizes = [1, 256], strides = [1, 1]} : vector<8x256xf32> to vector<1x256xf32>
    %50 = vector.broadcast %48 : vector<32x1xf32> to vector<32x256xf32>
    %51 = vector.broadcast %49 : vector<1x256xf32> to vector<32x256xf32>
    %52 = arith.mulf %50, %51 : vector<32x256xf32>
    %53 = arith.addf %47, %52 : vector<32x256xf32>
    %c0_6 = arith.constant 0 : index
    %c0_7 = arith.constant 0 : index
    %c0_8 = arith.constant 0 : index
    %54 = vector.load %arg5[%c0_6, %c0_7, %c0_8] : memref<1x32x256xf32, #tpu.memory_space<vmem>>, vector<1x32x256xf32>
    %55 = vector.shape_cast %54 : vector<1x32x256xf32> to vector<32x256xf32>
    %56 = vector.shape_cast %53 : vector<32x256xf32> to vector<1x32x256xf32>
    tpu.vector_store %arg5[%c0_6, %c0_7, %c0_8], %56 {strides = array<i32>} : memref<1x32x256xf32, #tpu.memory_space<vmem>>, vector<1x32x256xf32>,
    return
  }
  func.func @transform_0(%arg0: i32, %arg1: i32) -> (i32, i32) {
    %c0_i32 = arith.constant 0 : i32
    %c0_i32_0 = arith.constant 0 : i32
    %c0_i32_1 = arith.constant 0 : i32
    return %c0_i32, %c0_i32_0 : i32, i32
  }
  func.func @transform_1(%arg0: i32, %arg1: i32) -> (i32, i32, i32) {
    %c0_i32 = arith.constant 0 : i32
    %c0_i32_0 = arith.constant 0 : i32
    return %arg0, %c0_i32, %arg1 : i32, i32, i32
  }
  func.func @transform_2(%arg0: i32, %arg1: i32) -> (i32, i32) {
    %c0_i32 = arith.constant 0 : i32
    %c0_i32_0 = arith.constant 0 : i32
    %c0_i32_1 = arith.constant 0 : i32
    return %c0_i32, %c0_i32_0 : i32, i32
  }
  func.func @transform_3(%arg0: i32, %arg1: i32) -> (i32, i32, i32) {
    %c0_i32 = arith.constant 0 : i32
    %c0_i32_0 = arith.constant 0 : i32
    return %arg0, %c0_i32, %arg1 : i32, i32, i32
  }
}

</mosaic_0001>

<bundles_post_ra>
// kernel: tpu_custom_call.1
= control target key start
LH: loop header
LB: loop body
LE: loop exit
PB: predicated region body
PF: predicated region fallthrough
CT: control target
= control target key end

     0   :  { %8 = vsyncpa [#allocation3], 0  ;;  %s1188_s0 = inlined_call_operand.vmem [shape: f32[32,8], index: 0, kind: input, shape index: {}]   ;;  %s1189_s1 = inlined_call_operand.vmem [shape: f32[2,8,256], index: 1, kind: input, shape index: {}]   ;;  %s1190_s2 = inlined_call_operand.vmem [shape: f32[32,1], index: 2, kind: input, shape index: {}]   ;;  %s1191_s3 = inlined_call_operand.hbm [shape: f32[2,32,256], index: 3, kind: output, shape index: {}]  }
   0x1   :  { %10 = vsyncpa [#allocation3 + $0x1], 0  ;;  %s864_s12 = smov 0   ;;  %s866_s13 = smov 0  }
   0x2   :  { %s868_s14 = smov 0   ;;  %s870_s15 = smov 0  }
   0x3   :  { %s872_s16 = smov 0   ;;  %s874_s17 = smov 0  }
   0x4 LB: > { %s657_s18 = sadd.s32 4294967295, %s831_s17   ;;  %s658_s19 = sadd.s32 4294967294, %s831_s17   ;;  %s831_s17 = sphi %s874_s17, %s16_s17   ;;  %s827_s16 = sphi %s872_s16, %s1198_s16   ;;  %s823_s15 = sphi %s870_s15, %s1197_s15   ;;  %s819_s14 = sphi %s868_s14, %s1196_s14   ;;  %s815_s13 = sphi %s866_s13, %s1195_s13   ;;  %s811_s12 = sphi %s864_s12, %s1194_s12  }
   0x5   : > { %s28_s20 = sadd.s32 1, %s827_s16  ;;  %s107_s21 = sadd.s32 1, %s819_s14 }
   0x6   : > { %p30_p0 = scmp.ge.s32.totalorder %s28_s20, 2  ;;  %p117_p1 = scmp.ne.s32.totalorder %s819_s14, %s815_s13 }
   0x7   : > { %p118_p2 = scmp.eq.s32.totalorder %s657_s18, 1  ;;  %p123_p3 = scmp.ne.s32.totalorder %s815_s13, %s811_s12 }
   0x8   : > { %s1200_s20 = smov (%p30_p0, %s28_s20), 0  ;;  %p124_p5 = scmp.eq.s32.totalorder %s658_s19, 1 }
   0x9   : > { %p904_p4 = por %p118_p2, %p117_p1  ;;  %s102_s23 = ssub.s32 %s827_s16, %s1200_s20 }
   0xa   : > { %p661_p6 = scmp.ge.s32.totalorder %s831_s17, 1  ;;  %p105_p7 = scmp.eq.s32.totalorder %s102_s23, 0 }
   0xb   : > { %p911_p8 = por %p124_p5, %p123_p3  ;;  %p161_p9 = scmp.lt.s32.totalorder %s831_s17, 3 }
   0xc   : > { %s917_s25 = scalar_select %p105_p7, %s819_s14, %s107_s21  }
   0xd   : > { %p162_p10 = pnand %p661_p6, %p161_p9 }
   0xe   : > { %v208_v0 = vld [vmem:[%s1190_s2 + $0x10] sm:$0xff] (!%p162_p10)  ;;  %v206_v1 = vld [vmem:[%s1190_s2] sm:$0xff] (!%p162_p10)  ;;  %v833_v2 = vmov (!%p162_p10), 0   ;;  %v209_v3 = vld [vmem:[%s1190_s2 + $0x18] sm:$0xff] (!%p162_p10)  ;;  %v834_v9 = vmov (!%p162_p10), 1   ;;  %v835_v10 = vmov (!%p162_p10), 2   ;;  %v250_v32 = vlaneseq (!%p162_p10) }
   0xf   : > { %165 = sbr.rel (%p162_p10) target bundleno = 250 (0xfa), region = 32  ;;  %738 = vset.pattern.permute.xlu1 (!%p162_p10), %v833_v2  ;;  %737 = vset.pattern.permute.xlu0 (!%p162_p10), %v833_v2  ;;  %v207_v4 = vld [vmem:[%s1190_s2 + $0x8] sm:$0xff] (!%p162_p10)  ;;  %v200_v6 = vld [vmem:[%s1188_s0] sm:$0xff] (!%p162_p10)  ;;  %v203_v7 = vld [vmem:[%s1188_s0 + $0x18] sm:$0xff] (!%p162_p10)  ;;  %v836_v11 = vmov (!%p162_p10), 3   ;;  %v837_v12 = vmov (!%p162_p10), 4  }
  0x10   : > { %222 = vperm.xlu1 (!%p162_p10), %738, %v208_v0   ;;  %212 = vperm.xlu0 (!%p162_p10), %737, %v206_v1   ;;  %v201_v5 = vld [vmem:[%s1188_s0 + $0x8] sm:$0xff] (!%p162_p10)  ;;  %v202_v8 = vld [vmem:[%s1188_s0 + $0x10] sm:$0xff] (!%p162_p10)  ;;  %v838_v13 = vmov (!%p162_p10), 5   ;;  %v839_v14 = vmov (!%p162_p10), 6   ;;  %v840_v15 = vmov (!%p162_p10), 7   ;;  %p190_p11 = scmp.lt.s32.totalorder (!%p162_p10), %s823_s15, 1 }
  0x11   : > { %v965_v35 = vshrl.u32 (!%p162_p10), %v250_v32, 7  ;;  %s186_s30 = sand.u32 (!%p162_p10), 1, %s815_s13   ;;  %s671_s6 = sshll.u32 (!%p162_p10), %s823_s15, 10 }
  0x12   : > { %s662_s4 = sshll.u32 (!%p162_p10), %s186_s30, 6  ;;  %s1134_s10 = scalar_lea.hbm (!%p162_p10), %s1191_s3, %s671_s6 }
  0x13   : > { %v252_v37 = vsub.s32 (!%p162_p10), 0, %v965_v35  ;;  %v292_v41 = vsub.s32 (!%p162_p10), 1, %v965_v35  ;;  %v332_v42 = vsub.s32 (!%p162_p10), 2, %v965_v35  ;;  %v372_v45 = vsub.s32 (!%p162_p10), 3, %v965_v35  ;;  %s1107_s5 = scalar_lea.vmem (!%p162_p10), [#allocation2], %s662_s4  ;;  %s841_s18 = smov (!%p162_p10), [#allocation2]  }
  0x14   : > { %227 = vperm.xlu1 (!%p162_p10), %738, %v209_v3   ;;  %217 = vperm.xlu0 (!%p162_p10), %737, %v207_v4   ;;  %v412_v46 = vsub.s32 (!%p162_p10), 4, %v965_v35  ;;  %v452_v48 = vsub.s32 (!%p162_p10), 5, %v965_v35  ;;  %v492_v55 = vsub.s32 (!%p162_p10), 6, %v965_v35  ;;  %s578_s7 = sshll.u32 (!%p162_p10), %s1107_s5, 4  ;;  %s757_s19 = sshll.u32 (!%p162_p10), %s841_s18, 4  ;;  %s1136_s7 = int_to_ptr.vmem [resolvable:$true] %s578_s7  ;;  %s758_s19 = int_to_ptr.vmem [resolvable:$false] %s757_s19 }
  0x15   : > { %s753_s11 = scalar_lea.vmem (!%p162_p10), %s1136_s7, 1024  ;;  %s759_s21 = scalar_lea.vmem (!%p162_p10), %s758_s19, 2048 }
  0x16   : > { %s191_s23 = scalar_select %p190_p11, %s823_s15, 1 }
  0x17   : > { %s1142_s15 = scalar_lea.sflag [#allocation3], %s186_s30  ;;  %p754_p12 = scmp.ne.s32.totalorder %s1136_s7, %s753_s11 }
  0x18   : > { %237 = vperm.xlu1 %738, %v201_v5   ;;  %232 = vperm.xlu0 %737, %v200_v6   ;;  %s670_s26 = sshll.u32 %s191_s23, 4  ;;  %p760_p1 = scmp.lt.s32.totalorder %s1136_s7, %s758_s19 }
  0x19   : > { %s197_s29 = scalar_lea.vmem %s1189_s1, %s670_s26  ;;  %p755_p13 = pnand %p754_p12, %p904_p4 }
  0x1a   : > { %v975_v39 = vld [vmem:[%s197_s29] sm:$0xff]  ;;  %v977_v40 = vld [vmem:[%s197_s29 + $0x8] sm:$0xff]  ;;  %p761_p2 = scmp.lt.s32.totalorder %s759_s21, %s753_s11 }
  0x1b   : > { %v253_v43 = vrot.slane %v975_v39, %v252_v37  ;;  %v257_v44 = vrot.slane %v977_v40, %v252_v37  ;;  %v293_v52 = vrot.slane %v975_v39, %v292_v41  ;;  %v297_v53 = vrot.slane %v977_v40, %v292_v41  ;;  %p756_p0 = pneg %p755_p13 }
  0x1c   : > { %247 = vperm.xlu1 %738, %v203_v7   ;;  %242 = vperm.xlu0 %737, %v202_v8   ;;  %v991_v54 = vrot.slane %v975_v39, %v332_v42  ;;  %v995_v56 = vrot.slane %v977_v40, %v332_v42  ;;  %v998_v57 = vrot.slane %v975_v39, %v372_v45  ;;  %p762_p3 = por %p761_p2, %p760_p1 }
  0x1d   : > { %v1001_v58 = vrot.slane %v977_v40, %v372_v45  ;;  %v1004_v59 = vrot.slane %v975_v39, %v412_v46  ;;  %v1009_v63 = vrot.slane %v977_v40, %v412_v46  ;;  %v1012_v0 = vrot.slane %v975_v39, %v452_v48 }
  0x1e   : > { %p763_p5 = pnand %p762_p3, %p756_p0 }
  0x20   : > { %740 = vset.pattern.permute.xlu1 %v834_v9  ;;  %739 = vset.pattern.permute.xlu0 %v834_v9  ;;  %v1018_v9 = vrot.slane %v975_v39, %v492_v55 }
  0x21   : > { %279 = vperm.xlu1 %740, %v201_v5   ;;  %275 = vperm.xlu0 %739, %v200_v6  }
  0x25   : > { %283 = vperm.xlu1 %740, %v202_v8   ;;  %287 = vperm.xlu0 %739, %v203_v7  }
  0x29   : > { %741 = vset.pattern.permute.xlu1 %v835_v10  ;;  %742 = vset.pattern.permute.xlu0 %v835_v10 }
  0x2a   : > { %315 = vperm.xlu1 %741, %v200_v6   ;;  %319 = vperm.xlu0 %742, %v201_v5  }
  0x2e   : > { %323 = vperm.xlu1 %741, %v202_v8   ;;  %743 = vset.pattern.permute.xlu0 %v836_v11 }
  0x2f   : > { %355 = vperm.xlu0 %743, %v200_v6  }
  0x32   : > { %327 = vperm.xlu1 %741, %v203_v7  }
  0x33   : > { %367 = vperm.xlu0 %743, %v203_v7  }
  0x36   : > { %744 = vset.pattern.permute.xlu1 %v836_v11 }
  0x37   : > { %359 = vperm.xlu1 %744, %v201_v5   ;;  %746 = vset.pattern.permute.xlu0 %v837_v12 }
  0x38   : > { %399 = vperm.xlu0 %746, %v201_v5  }
  0x3b   : > { %363 = vperm.xlu1 %744, %v202_v8  }
  0x3c   : > { %747 = vset.pattern.permute.xlu0 %v838_v13 }
  0x3d   : > { %435 = vperm.xlu0 %747, %v200_v6  }
  0x3f   : > { %745 = vset.pattern.permute.xlu1 %v837_v12 }
  0x40   : > { %395 = vperm.xlu1 %745, %v200_v6  }
  0x41   : > { %447 = vperm.xlu0 %747, %v203_v7  }
  0x44   : > { %403 = vperm.xlu1 %745, %v202_v8  }
  0x45   : > { %750 = vset.pattern.permute.xlu0 %v839_v14 }
  0x46   : > { %479 = vperm.xlu0 %750, %v201_v5  }
  0x48   : > { %407 = vperm.xlu1 %745, %v203_v7  }
  0x4a   : > { %751 = vset.pattern.permute.xlu0 %v840_v15 }
  0x4b   : > { %515 = vperm.xlu0 %751, %v200_v6  }
  0x4c   : > { %748 = vset.pattern.permute.xlu1 %v838_v13  ;;  %v1023_v13 = vrot.slane %v977_v40, %v492_v55 }
  0x4d   : > { %439 = vperm.xlu1 %748, %v201_v5  }
  0x4f   : > { %527 = vperm.xlu0 %751, %v203_v7  }
  0x51   : > { %443 = vperm.xlu1 %748, %v202_v8  }
  0x55   : > { %749 = vset.pattern.permute.xlu1 %v839_v14  ;;  %v532_v14 = vsub.s32 7, %v965_v35 }
  0x56   : > { %475 = vperm.xlu1 %749, %v200_v6  }
  0x5a   : > { %483 = vperm.xlu1 %749, %v202_v8  }
  0x5e   : > { %487 = vperm.xlu1 %749, %v203_v7  }
  0x62   : > { %752 = vset.pattern.permute.xlu1 %v840_v15 }
  0x63   : > { %519 = vperm.xlu1 %752, %v201_v5  }
  0x67   : > { %523 = vperm.xlu1 %752, %v202_v8   ;;  %v1015_v8 = vrot.slane %v977_v40, %v452_v48 }
  0x8f   : > { %v943_v16 = vpop.permute.xlu1 %222  ;;  %v213_v17 = vpop.permute.xlu0 %212 }
  0x93   : > { %v945_v18 = vpop.permute.xlu1 %227  ;;  %v947_v19 = vpop.permute.xlu0 %217 }
  0x97   : > { %v238_v20 = vpop.permute.xlu1 %237  ;;  %v233_v21 = vpop.permute.xlu0 %232 }
  0x98   : > { %v258_v49 = vmul.f32 %v253_v43, %v233_v21  ;;  %v259_v50 = vmul.f32 %v257_v44, %v233_v21  ;;  %v260_v61 = vmul.f32 %v253_v43, %v238_v20  ;;  %v261_v62 = vmul.f32 %v257_v44, %v238_v20 }
  0x9a   : > { %v266_v1 = vadd.f32 %v258_v49, %v213_v17  ;;  %v267_v2 = vadd.f32 %v259_v50, %v213_v17  ;;  %v268_v15 = vadd.f32 %v260_v61, %v947_v19  ;;  %v269_v17 = vadd.f32 %v261_v62, %v947_v19 }
  0x9b   : > { %v248_v22 = vpop.permute.xlu1 %247  ;;  %v243_v23 = vpop.permute.xlu0 %242 }
  0x9c   : > { %v264_v6 = vmul.f32 %v253_v43, %v248_v22  ;;  %v265_v7 = vmul.f32 %v257_v44, %v248_v22  ;;  %v262_v10 = vmul.f32 %v253_v43, %v243_v23  ;;  %v263_v11 = vmul.f32 %v257_v44, %v243_v23 }
  0x9e   : > { %v272_v41 = vadd.f32 %v264_v6, %v945_v18  ;;  %v273_v42 = vadd.f32 %v265_v7, %v945_v18  ;;  %v270_v19 = vadd.f32 %v262_v10, %v943_v16 }
  0xa0   : > { %v280_v24 = vpop.permute.xlu1 %279  ;;  %v276_v25 = vpop.permute.xlu0 %275 }
  0xa1   : > { %v298_v3 = vmul.f32 %v293_v52, %v276_v25  ;;  %v299_v4 = vmul.f32 %v297_v53, %v276_v25  ;;  %v300_v20 = vmul.f32 %v293_v52, %v280_v24  ;;  %v301_v21 = vmul.f32 %v297_v53, %v280_v24 }
  0xa2   : > { %v271_v24 = vadd.f32 %v263_v11, %v943_v16 }
  0xa3   : > { %v306_v22 = vadd.f32 %v298_v3, %v266_v1  ;;  %v307_v25 = vadd.f32 %v299_v4, %v267_v2  ;;  %v308_v45 = vadd.f32 %v300_v20, %v268_v15  ;;  %v309_v46 = vadd.f32 %v301_v21, %v269_v17 }
  0xa4   : > { %v949_v26 = vpop.permute.xlu1 %283  ;;  %v951_v27 = vpop.permute.xlu0 %287  ;;  %v1063_v21 = vrot.slane %v975_v39, %v532_v14 }
  0xa5   : > { %v304_v35 = vmul.f32 %v293_v52, %v951_v27  ;;  %v305_v43 = vmul.f32 %v297_v53, %v951_v27  ;;  %v302_v61 = vmul.f32 %v293_v52, %v949_v26  ;;  %v303_v62 = vmul.f32 %v297_v53, %v949_v26 }
  0xa7   : > { %v313_v1 = vadd.f32 %v305_v43, %v273_v42  ;;  %v310_v17 = vadd.f32 %v302_v61, %v270_v19  ;;  %v311_v20 = vadd.f32 %v303_v62, %v271_v24 }
  0xa9   : > { %v316_v28 = vpop.permute.xlu1 %315  ;;  %v956_v30 = vpop.permute.xlu0 %319 }
  0xaa   : > { %v338_v32 = vmul.f32 %v991_v54, %v316_v28  ;;  %v339_v37 = vmul.f32 %v995_v56, %v316_v28  ;;  %v340_v2 = vmul.f32 %v991_v54, %v956_v30  ;;  %v341_v3 = vmul.f32 %v995_v56, %v956_v30 }
  0xac   : > { %v346_v27 = vadd.f32 %v338_v32, %v306_v22  ;;  %v347_v50 = vadd.f32 %v339_v37, %v307_v25  ;;  %v1066_v22 = vrot.slane %v977_v40, %v532_v14  ;;  %v348_v25 = vadd.f32 %v340_v2, %v308_v45 }
  0xad   : > { %v953_v29 = vpop.permute.xlu1 %323  ;;  %v349_v32 = vadd.f32 %v341_v3, %v309_v46 }
  0xae   : > { %v961_v33 = vpop.permute.xlu0 %355  ;;  %v343_v39 = vmul.f32 %v995_v56, %v953_v29 }
  0xaf   : > { %v378_v44 = vmul.f32 %v998_v57, %v961_v33  ;;  %v379_v28 = vmul.f32 %v1001_v58, %v961_v33  ;;  %v312_v33 = vadd.f32 %v304_v35, %v272_v41 }
  0xb1   : > { %v958_v31 = vpop.permute.xlu1 %327  ;;  %v387_v4 = vadd.f32 %v379_v28, %v347_v50 }
  0xb2   : > { %v973_v38 = vpop.permute.xlu0 %367  ;;  %v344_v48 = vmul.f32 %v991_v54, %v958_v31  ;;  %v345_v18 = vmul.f32 %v995_v56, %v958_v31  ;;  %v386_v31 = vadd.f32 %v378_v44, %v346_v27 }
  0xb3   : > { %v385_v26 = vmul.f32 %v1001_v58, %v973_v38 }
  0xb4   : > { %v352_v7 = vadd.f32 %v344_v48, %v312_v33  ;;  %v353_v10 = vadd.f32 %v345_v18, %v313_v1  ;;  %v351_v1 = vadd.f32 %v343_v39, %v311_v20 }
  0xb6   : > { %v963_v34 = vpop.permute.xlu1 %359  ;;  %v393_v40 = vadd.f32 %v385_v26, %v353_v10 }
  0xb7   : > { %v986_v51 = vpop.permute.xlu0 %399  ;;  %v381_v37 = vmul.f32 %v1001_v58, %v963_v34 }
  0xb8   : > { %v420_v45 = vmul.f32 %v1004_v59, %v986_v51  ;;  %v421_v46 = vmul.f32 %v1009_v63, %v986_v51 }
  0xb9   : > { %v389_v28 = vadd.f32 %v381_v37, %v349_v32 }
  0xba   : > { %v970_v36 = vpop.permute.xlu1 %363 }
  0xbc   : > { %v436_v5 = vpop.permute.xlu0 %435 }
  0xbd   : > { %v458_v15 = vmul.f32 %v1012_v0, %v436_v5  ;;  %v459_v30 = vmul.f32 %v1015_v8, %v436_v5  ;;  %v342_v5 = vmul.f32 %v991_v54, %v953_v29 }
  0xbf   : > { %v396_v47 = vpop.permute.xlu1 %395  ;;  %v350_v33 = vadd.f32 %v342_v5, %v310_v17 }
  0xc0   : > { %v1030_v23 = vpop.permute.xlu0 %447  ;;  %v418_v55 = vmul.f32 %v1004_v59, %v396_v47  ;;  %v419_v16 = vmul.f32 %v1009_v63, %v396_v47  ;;  %v384_v47 = vmul.f32 %v998_v57, %v973_v38  ;;  %v380_v38 = vmul.f32 %v998_v57, %v963_v34 }
  0xc1   : > { %v465_v48 = vmul.f32 %v1015_v8, %v1030_v23 }
  0xc2   : > { %v426_v53 = vadd.f32 %v418_v55, %v386_v31  ;;  %v427_v11 = vadd.f32 %v419_v16, %v387_v4  ;;  %v392_v42 = vadd.f32 %v384_v47, %v352_v7  ;;  %v388_v56 = vadd.f32 %v380_v38, %v348_v25 }
  0xc3   : > { %v1006_v60 = vpop.permute.xlu1 %403  ;;  %v429_v31 = vadd.f32 %v421_v46, %v389_v28  ;;  %v382_v4 = vmul.f32 %v998_v57, %v970_v36 }
  0xc4   : > { %v466_v14 = vadd.f32 %v458_v15, %v426_v53  ;;  %v467_v35 = vadd.f32 %v459_v30, %v427_v11  ;;  %v428_v51 = vadd.f32 %v420_v45, %v388_v56  ;;  %v422_v10 = vmul.f32 %v1004_v59, %v1006_v60 }
  0xc5   : > { %v480_v6 = vpop.permute.xlu0 %479 }
  0xc6   : > { %v500_v47 = vmul.f32 %v1018_v9, %v480_v6  ;;  %v501_v26 = vmul.f32 %v1023_v13, %v480_v6  ;;  %v390_v6 = vadd.f32 %v382_v4, %v350_v33 }
  0xc7   : > { %v1020_v12 = vpop.permute.xlu1 %407 }
  0xc8   : > { %v424_v43 = vmul.f32 %v1004_v59, %v1020_v12  ;;  %v425_v19 = vmul.f32 %v1009_v63, %v1020_v12  ;;  %v464_v12 = vmul.f32 %v1012_v0, %v1030_v23  ;;  %v383_v23 = vmul.f32 %v1001_v58, %v970_v36 }
  0xc9   : > { %v430_v25 = vadd.f32 %v422_v10, %v390_v6 }
  0xca   : > { %v516_v41 = vpop.permute.xlu0 %515  ;;  %v432_v50 = vadd.f32 %v424_v43, %v392_v42  ;;  %v433_v55 = vadd.f32 %v425_v19, %v393_v40  ;;  %v391_v30 = vadd.f32 %v383_v23, %v351_v1 }
  0xcb   : > { %v538_v54 = vmul.f32 %v1063_v21, %v516_v41  ;;  %v539_v29 = vmul.f32 %v1066_v22, %v516_v41 }
  0xcc   : > { %v440_v49 = vpop.permute.xlu1 %439  ;;  %v472_v57 = vadd.f32 %v464_v12, %v432_v50  ;;  %v473_v53 = vadd.f32 %v465_v48, %v433_v55 }
  0xcd   : > { %v460_v16 = vmul.f32 %v1012_v0, %v440_v49  ;;  %v461_v61 = vmul.f32 %v1015_v8, %v440_v49  ;;  %v423_v49 = vmul.f32 %v1009_v63, %v1006_v60 }
  0xce   : > { %v528_v7 = vpop.permute.xlu0 %527 }
  0xcf   : > { %v468_v36 = vadd.f32 %v460_v16, %v428_v51  ;;  %v469_v58 = vadd.f32 %v461_v61, %v429_v31  ;;  %v544_v60 = vmul.f32 %v1063_v21, %v528_v7  ;;  %v545_v63 = vmul.f32 %v1066_v22, %v528_v7 }
  0xd0   : > { %v1058_v52 = vpop.permute.xlu1 %443  ;;  %v431_v32 = vadd.f32 %v423_v49, %v391_v30 }
  0xd1   : > { %v462_v38 = vmul.f32 %v1012_v0, %v1058_v52  ;;  %v463_v37 = vmul.f32 %v1015_v8, %v1058_v52  ;;  %v508_v41 = vadd.f32 %v500_v47, %v468_v36  ;;  %v509_v5 = vadd.f32 %v501_v26, %v469_v58 }
  0xd3   : > { %v470_v8 = vadd.f32 %v462_v38, %v430_v25  ;;  %v471_v52 = vadd.f32 %v463_v37, %v431_v32 }
  0xd5   : > { %v476_v24 = vpop.permute.xlu1 %475 }
  0xd6   : > { %v498_v34 = vmul.f32 %v1018_v9, %v476_v24  ;;  %v499_v44 = vmul.f32 %v1023_v13, %v476_v24 }
  0xd8   : > { %v506_v18 = vadd.f32 %v498_v34, %v466_v14  ;;  %v507_v27 = vadd.f32 %v499_v44, %v467_v35 }
  0xd9   : > { %v484_v62 = vpop.permute.xlu1 %483 }
  0xda   : > { %v546_v2 = vadd.f32 %v538_v54, %v506_v18  ;;  %v547_v3 = vadd.f32 %v539_v29, %v507_v27  ;;  %v502_v14 = vmul.f32 %v1018_v9, %v484_v62  ;;  %v503_v35 = vmul.f32 %v1023_v13, %v484_v62 }
  0xdc   : > { %554 = vst [vmem:[%s1107_s5] sm:$0xff] %v546_v2  ;;  %555 = vst [vmem:[%s1107_s5 + $0x8] sm:$0xff] %v547_v3  ;;  %v511_v44 = vadd.f32 %v503_v35, %v471_v52 }
  0xdd   : > { %v488_v11 = vpop.permute.xlu1 %487 }
  0xde   : > { %v504_v59 = vmul.f32 %v1018_v9, %v488_v11  ;;  %v505_v15 = vmul.f32 %v1023_v13, %v488_v11  ;;  %v510_v9 = vadd.f32 %v502_v14, %v470_v8 }
  0xe0   : > { %v512_v17 = vadd.f32 %v504_v59, %v472_v57  ;;  %v513_v20 = vadd.f32 %v505_v15, %v473_v53 }
  0xe2   : > { %v552_v39 = vadd.f32 %v544_v60, %v512_v17  ;;  %v553_v42 = vadd.f32 %v545_v63, %v513_v20  ;;  %v520_v40 = vpop.permute.xlu1 %519 }
  0xe3   : > { %v540_v43 = vmul.f32 %v1063_v21, %v520_v40  ;;  %v541_v0 = vmul.f32 %v1066_v22, %v520_v40 }
  0xe4   : > { %560 = vst [vmem:[%s1107_s5 + $0x30] sm:$0xff] %v552_v39  ;;  %561 = vst [vmem:[%s1107_s5 + $0x38] sm:$0xff] %v553_v42 }
  0xe5   : > { %v548_v19 = vadd.f32 %v540_v43, %v508_v41  ;;  %v549_v24 = vadd.f32 %v541_v0, %v509_v5 }
  0xe6   : > { %v524_v34 = vpop.permute.xlu1 %523 }
  0xe7   : > { %556 = vst [vmem:[%s1107_s5 + $0x10] sm:$0xff] %v548_v19  ;;  %557 = vst [vmem:[%s1107_s5 + $0x18] sm:$0xff] %v549_v24  ;;  %v542_v13 = vmul.f32 %v1063_v21, %v524_v34  ;;  %v543_v54 = vmul.f32 %v1066_v22, %v524_v34 }
  0xe9   : > { %v550_v29 = vadd.f32 %v542_v13, %v510_v9  ;;  %v551_v56 = vadd.f32 %v543_v54, %v511_v44 }
  0xeb   : > { %558 = vst [vmem:[%s1107_s5 + $0x20] sm:$0xff] %v550_v29  ;;  %559 = vst [vmem:[%s1107_s5 + $0x28] sm:$0xff] %v551_v56 }
  0xec   : > { %766 = shalt.err (!%p763_p5)
}
  0xed   : > { %s767_s23 = scalar_lea.hbm %s1134_s10, 1024  ;;  %s771_s28 = scalar_lea.hbm %s1191_s3, 2048 }
  0xee   : > { %p768_p6 = scmp.ne.s32.totalorder %s1134_s10, %s767_s23  ;;  %p772_p10 = scmp.lt.u32.totalorder %s1134_s10, %s1191_s3 }
  0xef   : > { %p773_p11 = scmp.lt.u32.totalorder %s771_s28, %s767_s23  ;;  %p775_p13 = scmp.lt.u32.totalorder %s767_s23, %s1134_s10 }
  0xf0   : > { %p769_p7 = pnand %p768_p6, %p904_p4 }
  0xf1   : > { %p774_p12 = por %p773_p11, %p772_p10 }
  0xf2   : > { %p770_p9 = pneg %p769_p7 }
  0xf3   : > { %p776_p0 = por %p775_p13, %p774_p12 }
  0xf5   : > { %p777_p1 = pnand %p776_p0, %p770_p9 }
  0xf7   : > { %780 = shalt.err (!%p777_p1)
}
  0xf8   : > { %s842_s4 = smov 256   ;;  %s843_s5 = smov 16  }
  0xf9   : > { %672 = dma.vmem_to_hbm [thread:$0]  (%p904_p4), %s1136_s7, 1024, %s1134_s10, %s1142_s15, %s842_s4, %s842_s4, %s843_s5  }
  0xfa PF: > { %p678_p2 = scmp.ge.s32.totalorder %s831_s17, 2  ;;  %s593_s6 = sand.u32 1, %s811_s12  }
  0xfb   : > { %s594_s8 = scalar_lea.sflag [#allocation3], %s593_s6 }
  0xfc   : > { %p675_p3 = pnand %p678_p2, %p911_p8 }
  0xfe   : > { %806 = dma.done.wait (!%p675_p3), %s594_s8, 1024  }
  0xff   : > { %808 = vsyncadd (!%p675_p3), %s594_s8, 4294966272  ;;  %s16_s17 = sadd.s32 1, %s831_s17   ;;  %s1194_s12 = smov %s815_s13 }
 0x100   : > { %p13_p5 = scmp.ge.s32.totalorder %s16_s17, 4   ;;  %s1195_s13 = smov %s819_s14 }
 0x101   : > { %s1196_s14 = smov %s917_s25  ;;  %s1197_s15 = smov %s827_s16 }
 0x102   : > { %s1198_s16 = smov %s1200_s20  ;;  %15 = sbr.rel (!%p13_p5) target bundleno = 4 (0x4), region = 67 }
 0x109   :  { %599 = vsyncpa [#allocation3], 1 }
 0x10a   :  { %601 = vsyncpa [#allocation3 + $0x1], 1 }

</bundles_post_ra>
